<compile_context>
chip_gen: v7x
topology: tpu7x:2x2x1
jax: 0.10.0
libtpu: 0.0.40
codegen_flags: <defaults>
</compile_context>

<pallas_src>
import functools

import jax
import jax.numpy as jnp
import numpy as np
from jax.experimental import pallas as pl
from jax.experimental.pallas import tpu as pltpu

# ----------------------------- model hyperparams -----------------------------
KERNEL_SIZES = (3, 4, 5)
NUM_FILTERS = 16          # small stand-in for 100
EMBED_DIM = 32            # small stand-in for 300
VOCAB_SIZE = 50
NUM_CLASSES = 4
BATCH = 2
SEQ_LEN = 16


def _round_up(x, m):
    return ((x + m - 1) // m) * m


# ------------------------------- fused kernel --------------------------------
def _cnn_fused_kernel(tok_ref, emb_ref, wbank_ref, bmask_ref, fcw_ref, fcb_ref,
                      out_ref, feat_ref, x_ref, *, batch, seq_len, l_pad,
                      kernel_sizes):
    """Whole forward pass in one kernel.

    tok_ref:   (B*S,)  int32 SMEM (scalar prefetch)
    emb_ref:   (V, E)  f32          wbank_ref: (Kmax*E, 3F) bf16
    bmask_ref: (B*Lp, 3F) f32 (conv bias at valid (l,f), -inf at invalid)
    fcw_ref:   (3F, C) bf16         fcb_ref:   (1, C) f32
    out_ref:   (B, C)  f32          feat_ref:  (B, 3F) f32
    x_ref:     (B, Lp + Kmax - 1, E) f32 VMEM scratch (gathered embeddings)
    """
    B, S, Lp = batch, seq_len, l_pad
    _, E = emb_ref.shape
    threeF = wbank_ref.shape[1]
    k_max = max(kernel_sizes)

    # Zero the padded activation buffer so pad rows are well-defined zeros
    # (they only ever meet zero weight-bank taps or masked positions, but
    # must not be garbage/NaN).
    x_ref[...] = jnp.zeros_like(x_ref)

    # ---- embedding gather: token ids live in SMEM, table is VMEM-resident ---
    # TODO(synk): at realistic vocab sizes keep the table in HBM (pl.ANY) and
    # gather rows with make_async_copy DMAs instead of VMEM indexed loads.
    for b in range(B):
        for s in range(S):
            tok = tok_ref[b * S + s]
            x_ref[b, pl.ds(s, 1), :] = emb_ref[pl.ds(tok, 1), :]

    # ---- conv widths as k_max accumulating MXU matmuls (no im2col) ----------
    # acc[b*Lp + l, g*F + f] = sum_t sum_e x[b, l+t, e] * W_g[f, e, t]
    acc = jnp.zeros((B * Lp, threeF), jnp.float32)
    for t in range(k_max):
        xt = x_ref[:, pl.ds(t, Lp), :]                  # (B, Lp, E), aligned
        xt = xt.reshape(B * Lp, E).astype(jnp.bfloat16)  # Lp % 8 == 0 -> free
        wt = wbank_ref[t * E:(t + 1) * E, :]            # static, aligned slice
        acc = acc + jnp.dot(xt, wt, preferred_element_type=jnp.float32)

    # ---- bias + validity mask folded into one precomputed additive array ----
    # Invalid (position, width) pairs get -inf, which relu turns into 0; this
    # never exceeds the true max-over-time because relu outputs are >= 0.
    act = jnp.maximum(acc + bmask_ref[...], 0.0)        # (B*Lp, 3F) f32

    # ---- max over time -> concatenated features (B, 3F) ---------------------
    feat = jnp.max(act.reshape(B, Lp, threeF), axis=1)  # aligned reshape
    feat_ref[...] = feat

    # ---- fc + softmax --------------------------------------------------------
    # TODO(synk): nn.Dropout(0.5) is identity at inference; training-mode
    # stochastic dropout is not applied here.
    logits = jnp.dot(feat.astype(jnp.bfloat16), fcw_ref[...],
                     preferred_element_type=jnp.float32) + fcb_ref[...]
    m = jnp.max(logits, axis=-1, keepdims=True)
    e = jnp.exp(logits - m)
    denom = jnp.sum(e, axis=-1, keepdims=True)
    out_ref[...] = e * pl.reciprocal(denom, approx=True)


# ------------------------------ pallas wrapper --------------------------------
def cnn_forward(packed, tokens):
    """Single fused Pallas call for the whole forward pass."""
    B, S = tokens.shape
    k_max, k_min = max(KERNEL_SIZES), min(KERNEL_SIZES)
    l_pad = _round_up(S - k_min + 1, 8)          # sublane-aligned time axis
    s_pad = l_pad + k_max - 1

    emb = packed['embedding']
    wbank, bmask = packed['wbank'], packed['bias_mask']
    fcw, fcb = packed['fc_w_t'], packed['fc_b']
    V, E = emb.shape
    KE, threeF = wbank.shape
    C = fcw.shape[1]

    kernel = functools.partial(
        _cnn_fused_kernel, batch=B, seq_len=S, l_pad=l_pad,
        kernel_sizes=KERNEL_SIZES)

    grid_spec = pltpu.PrefetchScalarGridSpec(
        num_scalar_prefetch=1,                   # token ids -> SMEM
        grid=(1,),
        in_specs=[
            pl.BlockSpec((V, E), lambda i, tok: (0, 0)),
            pl.BlockSpec((KE, threeF), lambda i, tok: (0, 0)),
            pl.BlockSpec((B * l_pad, threeF), lambda i, tok: (0, 0)),
            pl.BlockSpec((threeF, C), lambda i, tok: (0, 0)),
            pl.BlockSpec((1, C), lambda i, tok: (0, 0)),
        ],
        out_specs=[
            pl.BlockSpec((B, C), lambda i, tok: (0, 0)),
            pl.BlockSpec((B, threeF), lambda i, tok: (0, 0)),
        ],
        scratch_shapes=[pltpu.VMEM((B, s_pad, E), jnp.float32)],
    )

    out, feat = pl.pallas_call(
        kernel,
        out_shape=(jax.ShapeDtypeStruct((B, C), jnp.float32),
                   jax.ShapeDtypeStruct((B, threeF), jnp.float32)),
        grid_spec=grid_spec,
        # TODO(synk): when batch/seq scale up, grid over >=2 batch tiles marked
        # "parallel" (so work shards across v7x's two TensorCores) and size
        # tiles / vmem_limit_bytes per generation (64 MiB VMEM on v7x).
        compiler_params=pltpu.CompilerParams(
            dimension_semantics=("arbitrary",)),
    )(tokens.reshape(-1).astype(jnp.int32), emb, wbank, bmask, fcw, fcb)
    return out, feat


# --------------------------- one-time parameter pack ---------------------------
def pack_params(params, batch, seq_len):
    """Repack torch-layout conv weights into one stacked (Kmax*E, 3F) bf16 bank
    and precompute the additive bias+validity mask (B*Lp, 3F)."""
    k_max, k_min = max(KERNEL_SIZES), min(KERNEL_SIZES)
    l_pad = _round_up(seq_len - k_min + 1, 8)
    banks, mask_cols = [], []
    for k in KERNEL_SIZES:
        w = params[f'conv{k}_w']                       # (F, E, k) torch Conv1d
        wt = jnp.transpose(w, (2, 1, 0))               # (k, E, F)
        wt = jnp.pad(wt, ((0, k_max - k), (0, 0), (0, 0)))   # zero taps >= k
        banks.append(wt.reshape(k_max * EMBED_DIM, NUM_FILTERS))
        b = params[f'conv{k}_b']                       # (1, F)
        valid = (jnp.arange(l_pad) <= seq_len - k)[:, None]  # (Lp, 1)
        mask_cols.append(jnp.where(valid, b, -jnp.inf))      # (Lp, F)
    bias_mask = jnp.concatenate(mask_cols, axis=-1)          # (Lp, 3F)
    bias_mask = jnp.tile(bias_mask, (batch, 1))              # (B*Lp, 3F)
    return {
        'embedding': params['embedding'].astype(jnp.float32),
        'wbank': jnp.concatenate(banks, axis=-1).astype(jnp.bfloat16),
        'bias_mask': bias_mask.astype(jnp.float32),
        'fc_w_t': params['fc_w_t'].astype(jnp.bfloat16),
        'fc_b': params['fc_b'].astype(jnp.float32),
    }


# ------------------------------ pure-JAX reference ----------------------------
def cnn_forward_ref(params, tokens):
    emb = jnp.take(params['embedding'], tokens, axis=0)
    x = jnp.transpose(emb, (0, 2, 1)).astype(jnp.float32)     # (B, E, S)
    feats = []
    for k in KERNEL_SIZES:
        w = params[f'conv{k}_w']                              # (F, E, K)
        b = params[f'conv{k}_b'][0]                           # (F,)
        L = x.shape[-1] - k + 1
        acc = jnp.zeros((x.shape[0], w.shape[0], L), jnp.float32)
        for t in range(k):
            acc = acc + jnp.einsum('bel,fe->bfl', x[:, :, t:t + L], w[:, :, t])
        acc = jnp.maximum(acc + b[None, :, None], 0.0)
        feats.append(jnp.max(acc, axis=-1))
    feat = jnp.concatenate(feats, axis=-1)
    logits = feat @ params['fc_w_t'] + params['fc_b']
    return jax.nn.softmax(logits, axis=-1), feat


# ----------------------------------- main -------------------------------------
def make_params(key):
    keys = jax.random.split(key, 3 + 2 * len(KERNEL_SIZES))
    params = {}
    params['embedding'] = 0.1 * jax.random.normal(
        keys[0], (VOCAB_SIZE, EMBED_DIM), jnp.float32)
    for i, k in enumerate(KERNEL_SIZES):
        params[f'conv{k}_w'] = 0.1 * jax.random.normal(
            keys[1 + 2 * i], (NUM_FILTERS, EMBED_DIM, k), jnp.float32)
        params[f'conv{k}_b'] = 0.1 * jax.random.normal(
            keys[2 + 2 * i], (1, NUM_FILTERS), jnp.float32)
    in_feat = NUM_FILTERS * len(KERNEL_SIZES)
    # PyTorch Linear weight is (C, in); pass it transposed as (in, C)
    params['fc_w_t'] = 0.1 * jax.random.normal(
        keys[-2], (in_feat, NUM_CLASSES), jnp.float32)
    params['fc_b'] = 0.1 * jax.random.normal(
        keys[-1], (1, NUM_CLASSES), jnp.float32)
    return params


if __name__ == "__main__":
    key = jax.random.PRNGKey(0)
    pkey, tkey = jax.random.split(key)
    params = make_params(pkey)
    packed = pack_params(params, BATCH, SEQ_LEN)
    tokens = jax.random.randint(tkey, (BATCH, SEQ_LEN), 0, VOCAB_SIZE,
                                dtype=jnp.int32)

    fwd = jax.jit(cnn_forward)
    out, feat = fwd(packed, tokens)
    out = jax.block_until_ready(out)
    feat = jax.block_until_ready(feat)

    out_ref, feat_ref = cnn_forward_ref(params, tokens)
    assert out.shape == (BATCH, NUM_CLASSES)
    assert feat.shape == (BATCH, NUM_FILTERS * len(KERNEL_SIZES))
    # Tolerances account for bf16 matmul operands (f32 accumulate) and the
    # EUP approximate reciprocal in the softmax denominator.
    np.testing.assert_allclose(np.asarray(feat), np.asarray(feat_ref),
                               rtol=5e-2, atol=2e-2)
    np.testing.assert_allclose(np.asarray(out), np.asarray(out_ref),
                               rtol=5e-2, atol=1e-2)
    print("KERNEL_OK")
</pallas_src>

<mosaic_0001>
module attributes {stable_mosaic.version = 11 : i64} {
  func.func @_cnn_fused_kernel(%arg0: i32, %arg1: memref<32xi32, #tpu.memory_space<smem>>, %arg2: memref<50x32xf32, #tpu.memory_space<vmem>>, %arg3: memref<160x48xbf16, #tpu.memory_space<vmem>>, %arg4: memref<32x48xf32, #tpu.memory_space<vmem>>, %arg5: memref<48x4xbf16, #tpu.memory_space<vmem>>, %arg6: memref<1x4xf32, #tpu.memory_space<vmem>>, %arg7: memref<2x4xf32, #tpu.memory_space<vmem>>, %arg8: memref<2x48xf32, #tpu.memory_space<vmem>>, %arg9: memref<2x20x32xf32, #tpu.memory_space<vmem>>) attributes {dimension_semantics = [#tpu.dimension_semantics<arbitrary>], iteration_bounds = array<i64: 1>, scalar_prefetch = 1 : i64, scratch_operands = 1 : i64, tpu.core_type = #tpu.core_type<tc>, window_params = [{pipeline_mode = #tpu.pipeline_mode<synchronous>, transform_indices = @transform_0, window_bounds = array<i64: 50, 32>}, {pipeline_mode = #tpu.pipeline_mode<synchronous>, transform_indices = @transform_1, window_bounds = array<i64: 160, 48>}, {pipeline_mode = #tpu.pipeline_mode<synchronous>, transform_indices = @transform_2, window_bounds = array<i64: 32, 48>}, {pipeline_mode = #tpu.pipeline_mode<synchronous>, transform_indices = @transform_3, window_bounds = array<i64: 48, 4>}, {pipeline_mode = #tpu.pipeline_mode<synchronous>, transform_indices = @transform_4, window_bounds = array<i64: 1, 4>}, {pipeline_mode = #tpu.pipeline_mode<synchronous>, transform_indices = @transform_5, window_bounds = array<i64: 2, 4>}, {pipeline_mode = #tpu.pipeline_mode<synchronous>, transform_indices = @transform_6, window_bounds = array<i64: 2, 48>}]} {
    %cst = arith.constant 0.000000e+00 : f32
    %0 = vector.broadcast %cst : f32 to vector<2x20x32xf32>
    %c0 = arith.constant 0 : index
    %c0_0 = arith.constant 0 : index
    %c0_1 = arith.constant 0 : index
    %1 = vector.load %arg9[%c0, %c0_0, %c0_1] : memref<2x20x32xf32, #tpu.memory_space<vmem>>, vector<2x20x32xf32>
    tpu.vector_store %arg9[%c0, %c0_0, %c0_1], %0 {strides = array<i32>} : memref<2x20x32xf32, #tpu.memory_space<vmem>>, vector<2x20x32xf32>,
    %c0_2 = arith.constant 0 : index
    %2 = memref.load %arg1[%c0_2] : memref<32xi32, #tpu.memory_space<smem>>
    %3 = arith.index_cast %2 : i32 to index
    %c0_3 = arith.constant 0 : index
    %4 = vector.load %arg2[%3, %c0_3] : memref<50x32xf32, #tpu.memory_space<vmem>>, vector<1x32xf32>
    %c0_4 = arith.constant 0 : index
    %c0_5 = arith.constant 0 : index
    %c0_6 = arith.constant 0 : index
    %5 = vector.load %arg9[%c0_4, %c0_5, %c0_6] : memref<2x20x32xf32, #tpu.memory_space<vmem>>, vector<1x1x32xf32>
    %6 = vector.shape_cast %5 : vector<1x1x32xf32> to vector<1x32xf32>
    %7 = vector.shape_cast %4 : vector<1x32xf32> to vector<1x1x32xf32>
    tpu.vector_store %arg9[%c0_4, %c0_5, %c0_6], %7 {strides = array<i32>} : memref<2x20x32xf32, #tpu.memory_space<vmem>>, vector<1x1x32xf32>,
    %c1 = arith.constant 1 : index
    %8 = memref.load %arg1[%c1] : memref<32xi32, #tpu.memory_space<smem>>
    %9 = arith.index_cast %8 : i32 to index
    %c0_7 = arith.constant 0 : index
    %10 = vector.load %arg2[%9, %c0_7] : memref<50x32xf32, #tpu.memory_space<vmem>>, vector<1x32xf32>
    %c0_8 = arith.constant 0 : index
    %c1_9 = arith.constant 1 : index
    %c0_10 = arith.constant 0 : index
    %11 = vector.load %arg9[%c0_8, %c1_9, %c0_10] : memref<2x20x32xf32, #tpu.memory_space<vmem>>, vector<1x1x32xf32>
    %12 = vector.shape_cast %11 : vector<1x1x32xf32> to vector<1x32xf32>
    %13 = vector.shape_cast %10 : vector<1x32xf32> to vector<1x1x32xf32>
    tpu.vector_store %arg9[%c0_8, %c1_9, %c0_10], %13 {strides = array<i32>} : memref<2x20x32xf32, #tpu.memory_space<vmem>>, vector<1x1x32xf32>,
    %c2 = arith.constant 2 : index
    %14 = memref.load %arg1[%c2] : memref<32xi32, #tpu.memory_space<smem>>
    %15 = arith.index_cast %14 : i32 to index
    %c0_11 = arith.constant 0 : index
    %16 = vector.load %arg2[%15, %c0_11] : memref<50x32xf32, #tpu.memory_space<vmem>>, vector<1x32xf32>
    %c0_12 = arith.constant 0 : index
    %c2_13 = arith.constant 2 : index
    %c0_14 = arith.constant 0 : index
    %17 = vector.load %arg9[%c0_12, %c2_13, %c0_14] : memref<2x20x32xf32, #tpu.memory_space<vmem>>, vector<1x1x32xf32>
    %18 = vector.shape_cast %17 : vector<1x1x32xf32> to vector<1x32xf32>
    %19 = vector.shape_cast %16 : vector<1x32xf32> to vector<1x1x32xf32>
    tpu.vector_store %arg9[%c0_12, %c2_13, %c0_14], %19 {strides = array<i32>} : memref<2x20x32xf32, #tpu.memory_space<vmem>>, vector<1x1x32xf32>,
    %c3 = arith.constant 3 : index
    %20 = memref.load %arg1[%c3] : memref<32xi32, #tpu.memory_space<smem>>
    %21 = arith.index_cast %20 : i32 to index
    %c0_15 = arith.constant 0 : index
    %22 = vector.load %arg2[%21, %c0_15] : memref<50x32xf32, #tpu.memory_space<vmem>>, vector<1x32xf32>
    %c0_16 = arith.constant 0 : index
    %c3_17 = arith.constant 3 : index
    %c0_18 = arith.constant 0 : index
    %23 = vector.load %arg9[%c0_16, %c3_17, %c0_18] : memref<2x20x32xf32, #tpu.memory_space<vmem>>, vector<1x1x32xf32>
    %24 = vector.shape_cast %23 : vector<1x1x32xf32> to vector<1x32xf32>
    %25 = vector.shape_cast %22 : vector<1x32xf32> to vector<1x1x32xf32>
    tpu.vector_store %arg9[%c0_16, %c3_17, %c0_18], %25 {strides = array<i32>} : memref<2x20x32xf32, #tpu.memory_space<vmem>>, vector<1x1x32xf32>,
    %c4 = arith.constant 4 : index
    %26 = memref.load %arg1[%c4] : memref<32xi32, #tpu.memory_space<smem>>
    %27 = arith.index_cast %26 : i32 to index
    %c0_19 = arith.constant 0 : index
    %28 = vector.load %arg2[%27, %c0_19] : memref<50x32xf32, #tpu.memory_space<vmem>>, vector<1x32xf32>
    %c0_20 = arith.constant 0 : index
    %c4_21 = arith.constant 4 : index
    %c0_22 = arith.constant 0 : index
    %29 = vector.load %arg9[%c0_20, %c4_21, %c0_22] : memref<2x20x32xf32, #tpu.memory_space<vmem>>, vector<1x1x32xf32>
    %30 = vector.shape_cast %29 : vector<1x1x32xf32> to vector<1x32xf32>
    %31 = vector.shape_cast %28 : vector<1x32xf32> to vector<1x1x32xf32>
    tpu.vector_store %arg9[%c0_20, %c4_21, %c0_22], %31 {strides = array<i32>} : memref<2x20x32xf32, #tpu.memory_space<vmem>>, vector<1x1x32xf32>,
    %c5 = arith.constant 5 : index
    %32 = memref.load %arg1[%c5] : memref<32xi32, #tpu.memory_space<smem>>
    %33 = arith.index_cast %32 : i32 to index
    %c0_23 = arith.constant 0 : index
    %34 = vector.load %arg2[%33, %c0_23] : memref<50x32xf32, #tpu.memory_space<vmem>>, vector<1x32xf32>
    %c0_24 = arith.constant 0 : index
    %c5_25 = arith.constant 5 : index
    %c0_26 = arith.constant 0 : index
    %35 = vector.load %arg9[%c0_24, %c5_25, %c0_26] : memref<2x20x32xf32, #tpu.memory_space<vmem>>, vector<1x1x32xf32>
    %36 = vector.shape_cast %35 : vector<1x1x32xf32> to vector<1x32xf32>
    %37 = vector.shape_cast %34 : vector<1x32xf32> to vector<1x1x32xf32>
    tpu.vector_store %arg9[%c0_24, %c5_25, %c0_26], %37 {strides = array<i32>} : memref<2x20x32xf32, #tpu.memory_space<vmem>>, vector<1x1x32xf32>,
    %c6 = arith.constant 6 : index
    %38 = memref.load %arg1[%c6] : memref<32xi32, #tpu.memory_space<smem>>
    %39 = arith.index_cast %38 : i32 to index
    %c0_27 = arith.constant 0 : index
    %40 = vector.load %arg2[%39, %c0_27] : memref<50x32xf32, #tpu.memory_space<vmem>>, vector<1x32xf32>
    %c0_28 = arith.constant 0 : index
    %c6_29 = arith.constant 6 : index
    %c0_30 = arith.constant 0 : index
    %41 = vector.load %arg9[%c0_28, %c6_29, %c0_30] : memref<2x20x32xf32, #tpu.memory_space<vmem>>, vector<1x1x32xf32>
    %42 = vector.shape_cast %41 : vector<1x1x32xf32> to vector<1x32xf32>
    %43 = vector.shape_cast %40 : vector<1x32xf32> to vector<1x1x32xf32>
    tpu.vector_store %arg9[%c0_28, %c6_29, %c0_30], %43 {strides = array<i32>} : memref<2x20x32xf32, #tpu.memory_space<vmem>>, vector<1x1x32xf32>,
    %c7 = arith.constant 7 : index
    %44 = memref.load %arg1[%c7] : memref<32xi32, #tpu.memory_space<smem>>
    %45 = arith.index_cast %44 : i32 to index
    %c0_31 = arith.constant 0 : index
    %46 = vector.load %arg2[%45, %c0_31] : memref<50x32xf32, #tpu.memory_space<vmem>>, vector<1x32xf32>
    %c0_32 = arith.constant 0 : index
    %c7_33 = arith.constant 7 : index
    %c0_34 = arith.constant 0 : index
    %47 = vector.load %arg9[%c0_32, %c7_33, %c0_34] : memref<2x20x32xf32, #tpu.memory_space<vmem>>, vector<1x1x32xf32>
    %48 = vector.shape_cast %47 : vector<1x1x32xf32> to vector<1x32xf32>
    %49 = vector.shape_cast %46 : vector<1x32xf32> to vector<1x1x32xf32>
    tpu.vector_store %arg9[%c0_32, %c7_33, %c0_34], %49 {strides = array<i32>} : memref<2x20x32xf32, #tpu.memory_space<vmem>>, vector<1x1x32xf32>,
    %c8 = arith.constant 8 : index
    %50 = memref.load %arg1[%c8] : memref<32xi32, #tpu.memory_space<smem>>
    %51 = arith.index_cast %50 : i32 to index
    %c0_35 = arith.constant 0 : index
    %52 = vector.load %arg2[%51, %c0_35] : memref<50x32xf32, #tpu.memory_space<vmem>>, vector<1x32xf32>
    %c0_36 = arith.constant 0 : index
    %c8_37 = arith.constant 8 : index
    %c0_38 = arith.constant 0 : index
    %53 = vector.load %arg9[%c0_36, %c8_37, %c0_38] : memref<2x20x32xf32, #tpu.memory_space<vmem>>, vector<1x1x32xf32>
    %54 = vector.shape_cast %53 : vector<1x1x32xf32> to vector<1x32xf32>
    %55 = vector.shape_cast %52 : vector<1x32xf32> to vector<1x1x32xf32>
    tpu.vector_store %arg9[%c0_36, %c8_37, %c0_38], %55 {strides = array<i32>} : memref<2x20x32xf32, #tpu.memory_space<vmem>>, vector<1x1x32xf32>,
    %c9 = arith.constant 9 : index
    %56 = memref.load %arg1[%c9] : memref<32xi32, #tpu.memory_space<smem>>
    %57 = arith.index_cast %56 : i32 to index
    %c0_39 = arith.constant 0 : index
    %58 = vector.load %arg2[%57, %c0_39] : memref<50x32xf32, #tpu.memory_space<vmem>>, vector<1x32xf32>
    %c0_40 = arith.constant 0 : index
    %c9_41 = arith.constant 9 : index
    %c0_42 = arith.constant 0 : index
    %59 = vector.load %arg9[%c0_40, %c9_41, %c0_42] : memref<2x20x32xf32, #tpu.memory_space<vmem>>, vector<1x1x32xf32>
    %60 = vector.shape_cast %59 : vector<1x1x32xf32> to vector<1x32xf32>
    %61 = vector.shape_cast %58 : vector<1x32xf32> to vector<1x1x32xf32>
    tpu.vector_store %arg9[%c0_40, %c9_41, %c0_42], %61 {strides = array<i32>} : memref<2x20x32xf32, #tpu.memory_space<vmem>>, vector<1x1x32xf32>,
    %c10 = arith.constant 10 : index
    %62 = memref.load %arg1[%c10] : memref<32xi32, #tpu.memory_space<smem>>
    %63 = arith.index_cast %62 : i32 to index
    %c0_43 = arith.constant 0 : index
    %64 = vector.load %arg2[%63, %c0_43] : memref<50x32xf32, #tpu.memory_space<vmem>>, vector<1x32xf32>
    %c0_44 = arith.constant 0 : index
    %c10_45 = arith.constant 10 : index
    %c0_46 = arith.constant 0 : index
    %65 = vector.load %arg9[%c0_44, %c10_45, %c0_46] : memref<2x20x32xf32, #tpu.memory_space<vmem>>, vector<1x1x32xf32>
    %66 = vector.shape_cast %65 : vector<1x1x32xf32> to vector<1x32xf32>
    %67 = vector.shape_cast %64 : vector<1x32xf32> to vector<1x1x32xf32>
    tpu.vector_store %arg9[%c0_44, %c10_45, %c0_46], %67 {strides = array<i32>} : memref<2x20x32xf32, #tpu.memory_space<vmem>>, vector<1x1x32xf32>,
    %c11 = arith.constant 11 : index
    %68 = memref.load %arg1[%c11] : memref<32xi32, #tpu.memory_space<smem>>
    %69 = arith.index_cast %68 : i32 to index
    %c0_47 = arith.constant 0 : index
    %70 = vector.load %arg2[%69, %c0_47] : memref<50x32xf32, #tpu.memory_space<vmem>>, vector<1x32xf32>
    %c0_48 = arith.constant 0 : index
    %c11_49 = arith.constant 11 : index
    %c0_50 = arith.constant 0 : index
    %71 = vector.load %arg9[%c0_48, %c11_49, %c0_50] : memref<2x20x32xf32, #tpu.memory_space<vmem>>, vector<1x1x32xf32>
    %72 = vector.shape_cast %71 : vector<1x1x32xf32> to vector<1x32xf32>
    %73 = vector.shape_cast %70 : vector<1x32xf32> to vector<1x1x32xf32>
    tpu.vector_store %arg9[%c0_48, %c11_49, %c0_50], %73 {strides = array<i32>} : memref<2x20x32xf32, #tpu.memory_space<vmem>>, vector<1x1x32xf32>,
    %c12 = arith.constant 12 : index
    %74 = memref.load %arg1[%c12] : memref<32xi32, #tpu.memory_space<smem>>
    %75 = arith.index_cast %74 : i32 to index
    %c0_51 = arith.constant 0 : index
    %76 = vector.load %arg2[%75, %c0_51] : memref<50x32xf32, #tpu.memory_space<vmem>>, vector<1x32xf32>
    %c0_52 = arith.constant 0 : index
    %c12_53 = arith.constant 12 : index
    %c0_54 = arith.constant 0 : index
    %77 = vector.load %arg9[%c0_52, %c12_53, %c0_54] : memref<2x20x32xf32, #tpu.memory_space<vmem>>, vector<1x1x32xf32>
    %78 = vector.shape_cast %77 : vector<1x1x32xf32> to vector<1x32xf32>
    %79 = vector.shape_cast %76 : vector<1x32xf32> to vector<1x1x32xf32>
    tpu.vector_store %arg9[%c0_52, %c12_53, %c0_54], %79 {strides = array<i32>} : memref<2x20x32xf32, #tpu.memory_space<vmem>>, vector<1x1x32xf32>,
    %c13 = arith.constant 13 : index
    %80 = memref.load %arg1[%c13] : memref<32xi32, #tpu.memory_space<smem>>
    %81 = arith.index_cast %80 : i32 to index
    %c0_55 = arith.constant 0 : index
    %82 = vector.load %arg2[%81, %c0_55] : memref<50x32xf32, #tpu.memory_space<vmem>>, vector<1x32xf32>
    %c0_56 = arith.constant 0 : index
    %c13_57 = arith.constant 13 : index
    %c0_58 = arith.constant 0 : index
    %83 = vector.load %arg9[%c0_56, %c13_57, %c0_58] : memref<2x20x32xf32, #tpu.memory_space<vmem>>, vector<1x1x32xf32>
    %84 = vector.shape_cast %83 : vector<1x1x32xf32> to vector<1x32xf32>
    %85 = vector.shape_cast %82 : vector<1x32xf32> to vector<1x1x32xf32>
    tpu.vector_store %arg9[%c0_56, %c13_57, %c0_58], %85 {strides = array<i32>} : memref<2x20x32xf32, #tpu.memory_space<vmem>>, vector<1x1x32xf32>,
    %c14 = arith.constant 14 : index
    %86 = memref.load %arg1[%c14] : memref<32xi32, #tpu.memory_space<smem>>
    %87 = arith.index_cast %86 : i32 to index
    %c0_59 = arith.constant 0 : index
    %88 = vector.load %arg2[%87, %c0_59] : memref<50x32xf32, #tpu.memory_space<vmem>>, vector<1x32xf32>
    %c0_60 = arith.constant 0 : index
    %c14_61 = arith.constant 14 : index
    %c0_62 = arith.constant 0 : index
    %89 = vector.load %arg9[%c0_60, %c14_61, %c0_62] : memref<2x20x32xf32, #tpu.memory_space<vmem>>, vector<1x1x32xf32>
    %90 = vector.shape_cast %89 : vector<1x1x32xf32> to vector<1x32xf32>
    %91 = vector.shape_cast %88 : vector<1x32xf32> to vector<1x1x32xf32>
    tpu.vector_store %arg9[%c0_60, %c14_61, %c0_62], %91 {strides = array<i32>} : memref<2x20x32xf32, #tpu.memory_space<vmem>>, vector<1x1x32xf32>,
    %c15 = arith.constant 15 : index
    %92 = memref.load %arg1[%c15] : memref<32xi32, #tpu.memory_space<smem>>
    %93 = arith.index_cast %92 : i32 to index
    %c0_63 = arith.constant 0 : index
    %94 = vector.load %arg2[%93, %c0_63] : memref<50x32xf32, #tpu.memory_space<vmem>>, vector<1x32xf32>
    %c0_64 = arith.constant 0 : index
    %c15_65 = arith.constant 15 : index
    %c0_66 = arith.constant 0 : index
    %95 = vector.load %arg9[%c0_64, %c15_65, %c0_66] : memref<2x20x32xf32, #tpu.memory_space<vmem>>, vector<1x1x32xf32>
    %96 = vector.shape_cast %95 : vector<1x1x32xf32> to vector<1x32xf32>
    %97 = vector.shape_cast %94 : vector<1x32xf32> to vector<1x1x32xf32>
    tpu.vector_store %arg9[%c0_64, %c15_65, %c0_66], %97 {strides = array<i32>} : memref<2x20x32xf32, #tpu.memory_space<vmem>>, vector<1x1x32xf32>,
    %c16 = arith.constant 16 : index
    %98 = memref.load %arg1[%c16] : memref<32xi32, #tpu.memory_space<smem>>
    %99 = arith.index_cast %98 : i32 to index
    %c0_67 = arith.constant 0 : index
    %100 = vector.load %arg2[%99, %c0_67] : memref<50x32xf32, #tpu.memory_space<vmem>>, vector<1x32xf32>
    %c1_68 = arith.constant 1 : index
    %c0_69 = arith.constant 0 : index
    %c0_70 = arith.constant 0 : index
    %101 = vector.load %arg9[%c1_68, %c0_69, %c0_70] : memref<2x20x32xf32, #tpu.memory_space<vmem>>, vector<1x1x32xf32>
    %102 = vector.shape_cast %101 : vector<1x1x32xf32> to vector<1x32xf32>
    %103 = vector.shape_cast %100 : vector<1x32xf32> to vector<1x1x32xf32>
    tpu.vector_store %arg9[%c1_68, %c0_69, %c0_70], %103 {strides = array<i32>} : memref<2x20x32xf32, #tpu.memory_space<vmem>>, vector<1x1x32xf32>,
    %c17 = arith.constant 17 : index
    %104 = memref.load %arg1[%c17] : memref<32xi32, #tpu.memory_space<smem>>
    %105 = arith.index_cast %104 : i32 to index
    %c0_71 = arith.constant 0 : index
    %106 = vector.load %arg2[%105, %c0_71] : memref<50x32xf32, #tpu.memory_space<vmem>>, vector<1x32xf32>
    %c1_72 = arith.constant 1 : index
    %c1_73 = arith.constant 1 : index
    %c0_74 = arith.constant 0 : index
    %107 = vector.load %arg9[%c1_72, %c1_73, %c0_74] : memref<2x20x32xf32, #tpu.memory_space<vmem>>, vector<1x1x32xf32>
    %108 = vector.shape_cast %107 : vector<1x1x32xf32> to vector<1x32xf32>
    %109 = vector.shape_cast %106 : vector<1x32xf32> to vector<1x1x32xf32>
    tpu.vector_store %arg9[%c1_72, %c1_73, %c0_74], %109 {strides = array<i32>} : memref<2x20x32xf32, #tpu.memory_space<vmem>>, vector<1x1x32xf32>,
    %c18 = arith.constant 18 : index
    %110 = memref.load %arg1[%c18] : memref<32xi32, #tpu.memory_space<smem>>
    %111 = arith.index_cast %110 : i32 to index
    %c0_75 = arith.constant 0 : index
    %112 = vector.load %arg2[%111, %c0_75] : memref<50x32xf32, #tpu.memory_space<vmem>>, vector<1x32xf32>
    %c1_76 = arith.constant 1 : index
    %c2_77 = arith.constant 2 : index
    %c0_78 = arith.constant 0 : index
    %113 = vector.load %arg9[%c1_76, %c2_77, %c0_78] : memref<2x20x32xf32, #tpu.memory_space<vmem>>, vector<1x1x32xf32>
    %114 = vector.shape_cast %113 : vector<1x1x32xf32> to vector<1x32xf32>
    %115 = vector.shape_cast %112 : vector<1x32xf32> to vector<1x1x32xf32>
    tpu.vector_store %arg9[%c1_76, %c2_77, %c0_78], %115 {strides = array<i32>} : memref<2x20x32xf32, #tpu.memory_space<vmem>>, vector<1x1x32xf32>,
    %c19 = arith.constant 19 : index
    %116 = memref.load %arg1[%c19] : memref<32xi32, #tpu.memory_space<smem>>
    %117 = arith.index_cast %116 : i32 to index
    %c0_79 = arith.constant 0 : index
    %118 = vector.load %arg2[%117, %c0_79] : memref<50x32xf32, #tpu.memory_space<vmem>>, vector<1x32xf32>
    %c1_80 = arith.constant 1 : index
    %c3_81 = arith.constant 3 : index
    %c0_82 = arith.constant 0 : index
    %119 = vector.load %arg9[%c1_80, %c3_81, %c0_82] : memref<2x20x32xf32, #tpu.memory_space<vmem>>, vector<1x1x32xf32>
    %120 = vector.shape_cast %119 : vector<1x1x32xf32> to vector<1x32xf32>
    %121 = vector.shape_cast %118 : vector<1x32xf32> to vector<1x1x32xf32>
    tpu.vector_store %arg9[%c1_80, %c3_81, %c0_82], %121 {strides = array<i32>} : memref<2x20x32xf32, #tpu.memory_space<vmem>>, vector<1x1x32xf32>,
    %c20 = arith.constant 20 : index
    %122 = memref.load %arg1[%c20] : memref<32xi32, #tpu.memory_space<smem>>
    %123 = arith.index_cast %122 : i32 to index
    %c0_83 = arith.constant 0 : index
    %124 = vector.load %arg2[%123, %c0_83] : memref<50x32xf32, #tpu.memory_space<vmem>>, vector<1x32xf32>
    %c1_84 = arith.constant 1 : index
    %c4_85 = arith.constant 4 : index
    %c0_86 = arith.constant 0 : index
    %125 = vector.load %arg9[%c1_84, %c4_85, %c0_86] : memref<2x20x32xf32, #tpu.memory_space<vmem>>, vector<1x1x32xf32>
    %126 = vector.shape_cast %125 : vector<1x1x32xf32> to vector<1x32xf32>
    %127 = vector.shape_cast %124 : vector<1x32xf32> to vector<1x1x32xf32>
    tpu.vector_store %arg9[%c1_84, %c4_85, %c0_86], %127 {strides = array<i32>} : memref<2x20x32xf32, #tpu.memory_space<vmem>>, vector<1x1x32xf32>,
    %c21 = arith.constant 21 : index
    %128 = memref.load %arg1[%c21] : memref<32xi32, #tpu.memory_space<smem>>
    %129 = arith.index_cast %128 : i32 to index
    %c0_87 = arith.constant 0 : index
    %130 = vector.load %arg2[%129, %c0_87] : memref<50x32xf32, #tpu.memory_space<vmem>>, vector<1x32xf32>
    %c1_88 = arith.constant 1 : index
    %c5_89 = arith.constant 5 : index
    %c0_90 = arith.constant 0 : index
    %131 = vector.load %arg9[%c1_88, %c5_89, %c0_90] : memref<2x20x32xf32, #tpu.memory_space<vmem>>, vector<1x1x32xf32>
    %132 = vector.shape_cast %131 : vector<1x1x32xf32> to vector<1x32xf32>
    %133 = vector.shape_cast %130 : vector<1x32xf32> to vector<1x1x32xf32>
    tpu.vector_store %arg9[%c1_88, %c5_89, %c0_90], %133 {strides = array<i32>} : memref<2x20x32xf32, #tpu.memory_space<vmem>>, vector<1x1x32xf32>,
    %c22 = arith.constant 22 : index
    %134 = memref.load %arg1[%c22] : memref<32xi32, #tpu.memory_space<smem>>
    %135 = arith.index_cast %134 : i32 to index
    %c0_91 = arith.constant 0 : index
    %136 = vector.load %arg2[%135, %c0_91] : memref<50x32xf32, #tpu.memory_space<vmem>>, vector<1x32xf32>
    %c1_92 = arith.constant 1 : index
    %c6_93 = arith.constant 6 : index
    %c0_94 = arith.constant 0 : index
    %137 = vector.load %arg9[%c1_92, %c6_93, %c0_94] : memref<2x20x32xf32, #tpu.memory_space<vmem>>, vector<1x1x32xf32>
    %138 = vector.shape_cast %137 : vector<1x1x32xf32> to vector<1x32xf32>
    %139 = vector.shape_cast %136 : vector<1x32xf32> to vector<1x1x32xf32>
    tpu.vector_store %arg9[%c1_92, %c6_93, %c0_94], %139 {strides = array<i32>} : memref<2x20x32xf32, #tpu.memory_space<vmem>>, vector<1x1x32xf32>,
    %c23 = arith.constant 23 : index
    %140 = memref.load %arg1[%c23] : memref<32xi32, #tpu.memory_space<smem>>
    %141 = arith.index_cast %140 : i32 to index
    %c0_95 = arith.constant 0 : index
    %142 = vector.load %arg2[%141, %c0_95] : memref<50x32xf32, #tpu.memory_space<vmem>>, vector<1x32xf32>
    %c1_96 = arith.constant 1 : index
    %c7_97 = arith.constant 7 : index
    %c0_98 = arith.constant 0 : index
    %143 = vector.load %arg9[%c1_96, %c7_97, %c0_98] : memref<2x20x32xf32, #tpu.memory_space<vmem>>, vector<1x1x32xf32>
    %144 = vector.shape_cast %143 : vector<1x1x32xf32> to vector<1x32xf32>
    %145 = vector.shape_cast %142 : vector<1x32xf32> to vector<1x1x32xf32>
    tpu.vector_store %arg9[%c1_96, %c7_97, %c0_98], %145 {strides = array<i32>} : memref<2x20x32xf32, #tpu.memory_space<vmem>>, vector<1x1x32xf32>,
    %c24 = arith.constant 24 : index
    %146 = memref.load %arg1[%c24] : memref<32xi32, #tpu.memory_space<smem>>
    %147 = arith.index_cast %146 : i32 to index
    %c0_99 = arith.constant 0 : index
    %148 = vector.load %arg2[%147, %c0_99] : memref<50x32xf32, #tpu.memory_space<vmem>>, vector<1x32xf32>
    %c1_100 = arith.constant 1 : index
    %c8_101 = arith.constant 8 : index
    %c0_102 = arith.constant 0 : index
    %149 = vector.load %arg9[%c1_100, %c8_101, %c0_102] : memref<2x20x32xf32, #tpu.memory_space<vmem>>, vector<1x1x32xf32>
    %150 = vector.shape_cast %149 : vector<1x1x32xf32> to vector<1x32xf32>
    %151 = vector.shape_cast %148 : vector<1x32xf32> to vector<1x1x32xf32>
    tpu.vector_store %arg9[%c1_100, %c8_101, %c0_102], %151 {strides = array<i32>} : memref<2x20x32xf32, #tpu.memory_space<vmem>>, vector<1x1x32xf32>,
    %c25 = arith.constant 25 : index
    %152 = memref.load %arg1[%c25] : memref<32xi32, #tpu.memory_space<smem>>
    %153 = arith.index_cast %152 : i32 to index
    %c0_103 = arith.constant 0 : index
    %154 = vector.load %arg2[%153, %c0_103] : memref<50x32xf32, #tpu.memory_space<vmem>>, vector<1x32xf32>
    %c1_104 = arith.constant 1 : index
    %c9_105 = arith.constant 9 : index
    %c0_106 = arith.constant 0 : index
    %155 = vector.load %arg9[%c1_104, %c9_105, %c0_106] : memref<2x20x32xf32, #tpu.memory_space<vmem>>, vector<1x1x32xf32>
    %156 = vector.shape_cast %155 : vector<1x1x32xf32> to vector<1x32xf32>
    %157 = vector.shape_cast %154 : vector<1x32xf32> to vector<1x1x32xf32>
    tpu.vector_store %arg9[%c1_104, %c9_105, %c0_106], %157 {strides = array<i32>} : memref<2x20x32xf32, #tpu.memory_space<vmem>>, vector<1x1x32xf32>,
    %c26 = arith.constant 26 : index
    %158 = memref.load %arg1[%c26] : memref<32xi32, #tpu.memory_space<smem>>
    %159 = arith.index_cast %158 : i32 to index
    %c0_107 = arith.constant 0 : index
    %160 = vector.load %arg2[%159, %c0_107] : memref<50x32xf32, #tpu.memory_space<vmem>>, vector<1x32xf32>
    %c1_108 = arith.constant 1 : index
    %c10_109 = arith.constant 10 : index
    %c0_110 = arith.constant 0 : index
    %161 = vector.load %arg9[%c1_108, %c10_109, %c0_110] : memref<2x20x32xf32, #tpu.memory_space<vmem>>, vector<1x1x32xf32>
    %162 = vector.shape_cast %161 : vector<1x1x32xf32> to vector<1x32xf32>
    %163 = vector.shape_cast %160 : vector<1x32xf32> to vector<1x1x32xf32>
    tpu.vector_store %arg9[%c1_108, %c10_109, %c0_110], %163 {strides = array<i32>} : memref<2x20x32xf32, #tpu.memory_space<vmem>>, vector<1x1x32xf32>,
    %c27 = arith.constant 27 : index
    %164 = memref.load %arg1[%c27] : memref<32xi32, #tpu.memory_space<smem>>
    %165 = arith.index_cast %164 : i32 to index
    %c0_111 = arith.constant 0 : index
    %166 = vector.load %arg2[%165, %c0_111] : memref<50x32xf32, #tpu.memory_space<vmem>>, vector<1x32xf32>
    %c1_112 = arith.constant 1 : index
    %c11_113 = arith.constant 11 : index
    %c0_114 = arith.constant 0 : index
    %167 = vector.load %arg9[%c1_112, %c11_113, %c0_114] : memref<2x20x32xf32, #tpu.memory_space<vmem>>, vector<1x1x32xf32>
    %168 = vector.shape_cast %167 : vector<1x1x32xf32> to vector<1x32xf32>
    %169 = vector.shape_cast %166 : vector<1x32xf32> to vector<1x1x32xf32>
    tpu.vector_store %arg9[%c1_112, %c11_113, %c0_114], %169 {strides = array<i32>} : memref<2x20x32xf32, #tpu.memory_space<vmem>>, vector<1x1x32xf32>,
    %c28 = arith.constant 28 : index
    %170 = memref.load %arg1[%c28] : memref<32xi32, #tpu.memory_space<smem>>
    %171 = arith.index_cast %170 : i32 to index
    %c0_115 = arith.constant 0 : index
    %172 = vector.load %arg2[%171, %c0_115] : memref<50x32xf32, #tpu.memory_space<vmem>>, vector<1x32xf32>
    %c1_116 = arith.constant 1 : index
    %c12_117 = arith.constant 12 : index
    %c0_118 = arith.constant 0 : index
    %173 = vector.load %arg9[%c1_116, %c12_117, %c0_118] : memref<2x20x32xf32, #tpu.memory_space<vmem>>, vector<1x1x32xf32>
    %174 = vector.shape_cast %173 : vector<1x1x32xf32> to vector<1x32xf32>
    %175 = vector.shape_cast %172 : vector<1x32xf32> to vector<1x1x32xf32>
    tpu.vector_store %arg9[%c1_116, %c12_117, %c0_118], %175 {strides = array<i32>} : memref<2x20x32xf32, #tpu.memory_space<vmem>>, vector<1x1x32xf32>,
    %c29 = arith.constant 29 : index
    %176 = memref.load %arg1[%c29] : memref<32xi32, #tpu.memory_space<smem>>
    %177 = arith.index_cast %176 : i32 to index
    %c0_119 = arith.constant 0 : index
    %178 = vector.load %arg2[%177, %c0_119] : memref<50x32xf32, #tpu.memory_space<vmem>>, vector<1x32xf32>
    %c1_120 = arith.constant 1 : index
    %c13_121 = arith.constant 13 : index
    %c0_122 = arith.constant 0 : index
    %179 = vector.load %arg9[%c1_120, %c13_121, %c0_122] : memref<2x20x32xf32, #tpu.memory_space<vmem>>, vector<1x1x32xf32>
    %180 = vector.shape_cast %179 : vector<1x1x32xf32> to vector<1x32xf32>
    %181 = vector.shape_cast %178 : vector<1x32xf32> to vector<1x1x32xf32>
    tpu.vector_store %arg9[%c1_120, %c13_121, %c0_122], %181 {strides = array<i32>} : memref<2x20x32xf32, #tpu.memory_space<vmem>>, vector<1x1x32xf32>,
    %c30 = arith.constant 30 : index
    %182 = memref.load %arg1[%c30] : memref<32xi32, #tpu.memory_space<smem>>
    %183 = arith.index_cast %182 : i32 to index
    %c0_123 = arith.constant 0 : index
    %184 = vector.load %arg2[%183, %c0_123] : memref<50x32xf32, #tpu.memory_space<vmem>>, vector<1x32xf32>
    %c1_124 = arith.constant 1 : index
    %c14_125 = arith.constant 14 : index
    %c0_126 = arith.constant 0 : index
    %185 = vector.load %arg9[%c1_124, %c14_125, %c0_126] : memref<2x20x32xf32, #tpu.memory_space<vmem>>, vector<1x1x32xf32>
    %186 = vector.shape_cast %185 : vector<1x1x32xf32> to vector<1x32xf32>
    %187 = vector.shape_cast %184 : vector<1x32xf32> to vector<1x1x32xf32>
    tpu.vector_store %arg9[%c1_124, %c14_125, %c0_126], %187 {strides = array<i32>} : memref<2x20x32xf32, #tpu.memory_space<vmem>>, vector<1x1x32xf32>,
    %c31 = arith.constant 31 : index
    %188 = memref.load %arg1[%c31] : memref<32xi32, #tpu.memory_space<smem>>
    %189 = arith.index_cast %188 : i32 to index
    %c0_127 = arith.constant 0 : index
    %190 = vector.load %arg2[%189, %c0_127] : memref<50x32xf32, #tpu.memory_space<vmem>>, vector<1x32xf32>
    %c1_128 = arith.constant 1 : index
    %c15_129 = arith.constant 15 : index
    %c0_130 = arith.constant 0 : index
    %191 = vector.load %arg9[%c1_128, %c15_129, %c0_130] : memref<2x20x32xf32, #tpu.memory_space<vmem>>, vector<1x1x32xf32>
    %192 = vector.shape_cast %191 : vector<1x1x32xf32> to vector<1x32xf32>
    %193 = vector.shape_cast %190 : vector<1x32xf32> to vector<1x1x32xf32>
    tpu.vector_store %arg9[%c1_128, %c15_129, %c0_130], %193 {strides = array<i32>} : memref<2x20x32xf32, #tpu.memory_space<vmem>>, vector<1x1x32xf32>,
    %cst_131 = arith.constant 0.000000e+00 : f32
    %194 = vector.broadcast %cst_131 : f32 to vector<32x48xf32>
    %c0_132 = arith.constant 0 : index
    %c0_133 = arith.constant 0 : index
    %c0_134 = arith.constant 0 : index
    %195 = vector.load %arg9[%c0_132, %c0_133, %c0_134] : memref<2x20x32xf32, #tpu.memory_space<vmem>>, vector<2x16x32xf32>
    %196 = vector.shape_cast %195 : vector<2x16x32xf32> to vector<32x32xf32>
    %197 = arith.truncf %196 : vector<32x32xf32> to vector<32x32xbf16>
    %c0_135 = arith.constant 0 : index
    %c0_136 = arith.constant 0 : index
    %198 = vector.load %arg3[%c0_135, %c0_136] : memref<160x48xbf16, #tpu.memory_space<vmem>>, vector<32x48xbf16>
    %cst_137 = arith.constant dense<0.000000e+00> : vector<32x48xf32>
    %199 = tpu.matmul %197, %198, %cst_137 {dimension_numbers = #tpu.dot_dimension_numbers<[1], [0], [0], [1], [0, 0, 1, 1], [], []>} : vector<32x32xbf16>, vector<32x48xbf16>, vector<32x48xf32> -> vector<32x48xf32>
    %200 = arith.addf %194, %199 : vector<32x48xf32>
    %c0_138 = arith.constant 0 : index
    %c1_139 = arith.constant 1 : index
    %c0_140 = arith.constant 0 : index
    %201 = vector.load %arg9[%c0_138, %c1_139, %c0_140] : memref<2x20x32xf32, #tpu.memory_space<vmem>>, vector<2x16x32xf32>
    %202 = vector.shape_cast %201 : vector<2x16x32xf32> to vector<32x32xf32>
    %203 = arith.truncf %202 : vector<32x32xf32> to vector<32x32xbf16>
    %c32 = arith.constant 32 : index
    %c0_141 = arith.constant 0 : index
    %204 = vector.load %arg3[%c32, %c0_141] : memref<160x48xbf16, #tpu.memory_space<vmem>>, vector<32x48xbf16>
    %cst_142 = arith.constant dense<0.000000e+00> : vector<32x48xf32>
    %205 = tpu.matmul %203, %204, %cst_142 {dimension_numbers = #tpu.dot_dimension_numbers<[1], [0], [0], [1], [0, 0, 1, 1], [], []>} : vector<32x32xbf16>, vector<32x48xbf16>, vector<32x48xf32> -> vector<32x48xf32>
    %206 = arith.addf %200, %205 : vector<32x48xf32>
    %c0_143 = arith.constant 0 : index
    %c2_144 = arith.constant 2 : index
    %c0_145 = arith.constant 0 : index
    %207 = vector.load %arg9[%c0_143, %c2_144, %c0_145] : memref<2x20x32xf32, #tpu.memory_space<vmem>>, vector<2x16x32xf32>
    %208 = vector.shape_cast %207 : vector<2x16x32xf32> to vector<32x32xf32>
    %209 = arith.truncf %208 : vector<32x32xf32> to vector<32x32xbf16>
    %c64 = arith.constant 64 : index
    %c0_146 = arith.constant 0 : index
    %210 = vector.load %arg3[%c64, %c0_146] : memref<160x48xbf16, #tpu.memory_space<vmem>>, vector<32x48xbf16>
    %cst_147 = arith.constant dense<0.000000e+00> : vector<32x48xf32>
    %211 = tpu.matmul %209, %210, %cst_147 {dimension_numbers = #tpu.dot_dimension_numbers<[1], [0], [0], [1], [0, 0, 1, 1], [], []>} : vector<32x32xbf16>, vector<32x48xbf16>, vector<32x48xf32> -> vector<32x48xf32>
    %212 = arith.addf %206, %211 : vector<32x48xf32>
    %c0_148 = arith.constant 0 : index
    %c3_149 = arith.constant 3 : index
    %c0_150 = arith.constant 0 : index
    %213 = vector.load %arg9[%c0_148, %c3_149, %c0_150] : memref<2x20x32xf32, #tpu.memory_space<vmem>>, vector<2x16x32xf32>
    %214 = vector.shape_cast %213 : vector<2x16x32xf32> to vector<32x32xf32>
    %215 = arith.truncf %214 : vector<32x32xf32> to vector<32x32xbf16>
    %c96 = arith.constant 96 : index
    %c0_151 = arith.constant 0 : index
    %216 = vector.load %arg3[%c96, %c0_151] : memref<160x48xbf16, #tpu.memory_space<vmem>>, vector<32x48xbf16>
    %cst_152 = arith.constant dense<0.000000e+00> : vector<32x48xf32>
    %217 = tpu.matmul %215, %216, %cst_152 {dimension_numbers = #tpu.dot_dimension_numbers<[1], [0], [0], [1], [0, 0, 1, 1], [], []>} : vector<32x32xbf16>, vector<32x48xbf16>, vector<32x48xf32> -> vector<32x48xf32>
    %218 = arith.addf %212, %217 : vector<32x48xf32>
    %c0_153 = arith.constant 0 : index
    %c4_154 = arith.constant 4 : index
    %c0_155 = arith.constant 0 : index
    %219 = vector.load %arg9[%c0_153, %c4_154, %c0_155] : memref<2x20x32xf32, #tpu.memory_space<vmem>>, vector<2x16x32xf32>
    %220 = vector.shape_cast %219 : vector<2x16x32xf32> to vector<32x32xf32>
    %221 = arith.truncf %220 : vector<32x32xf32> to vector<32x32xbf16>
    %c128 = arith.constant 128 : index
    %c0_156 = arith.constant 0 : index
    %222 = vector.load %arg3[%c128, %c0_156] : memref<160x48xbf16, #tpu.memory_space<vmem>>, vector<32x48xbf16>
    %cst_157 = arith.constant dense<0.000000e+00> : vector<32x48xf32>
    %223 = tpu.matmul %221, %222, %cst_157 {dimension_numbers = #tpu.dot_dimension_numbers<[1], [0], [0], [1], [0, 0, 1, 1], [], []>} : vector<32x32xbf16>, vector<32x48xbf16>, vector<32x48xf32> -> vector<32x48xf32>
    %224 = arith.addf %218, %223 : vector<32x48xf32>
    %c0_158 = arith.constant 0 : index
    %c0_159 = arith.constant 0 : index
    %225 = vector.load %arg4[%c0_158, %c0_159] : memref<32x48xf32, #tpu.memory_space<vmem>>, vector<32x48xf32>
    %226 = arith.addf %224, %225 : vector<32x48xf32>
    %cst_160 = arith.constant 0.000000e+00 : f32
    %227 = vector.broadcast %cst_160 : f32 to vector<32x48xf32>
    %228 = arith.maximumf %226, %227 : vector<32x48xf32>
    %229 = vector.shape_cast %228 : vector<32x48xf32> to vector<2x16x48xf32>
    %cst_161 = arith.constant dense<0xFF800000> : vector<2x48xf32>
    %230 = vector.multi_reduction <maximumf>, %229, %cst_161 [1] : vector<2x16x48xf32> to vector<2x48xf32>
    %c0_162 = arith.constant 0 : index
    %c0_163 = arith.constant 0 : index
    %231 = vector.load %arg8[%c0_162, %c0_163] : memref<2x48xf32, #tpu.memory_space<vmem>>, vector<2x48xf32>
    tpu.vector_store %arg8[%c0_162, %c0_163], %230 {strides = array<i32>} : memref<2x48xf32, #tpu.memory_space<vmem>>, vector<2x48xf32>,
    %232 = arith.truncf %230 : vector<2x48xf32> to vector<2x48xbf16>
    %c0_164 = arith.constant 0 : index
    %c0_165 = arith.constant 0 : index
    %233 = vector.load %arg5[%c0_164, %c0_165] : memref<48x4xbf16, #tpu.memory_space<vmem>>, vector<48x4xbf16>
    %cst_166 = arith.constant dense<0.000000e+00> : vector<2x4xf32>
    %234 = tpu.matmul %232, %233, %cst_166 {dimension_numbers = #tpu.dot_dimension_numbers<[1], [0], [0], [1], [0, 0, 1, 1], [], []>} : vector<2x48xbf16>, vector<48x4xbf16>, vector<2x4xf32> -> vector<2x4xf32>
    %c0_167 = arith.constant 0 : index
    %c0_168 = arith.constant 0 : index
    %235 = vector.load %arg6[%c0_167, %c0_168] : memref<1x4xf32, #tpu.memory_space<vmem>>, vector<1x4xf32>
    %236 = vector.broadcast %235 : vector<1x4xf32> to vector<2x4xf32>
    %237 = arith.addf %234, %236 : vector<2x4xf32>
    %cst_169 = arith.constant dense<0xFF800000> : vector<2xf32>
    %238 = vector.multi_reduction <maximumf>, %237, %cst_169 [1] : vector<2x4xf32> to vector<2xf32>
    %239 = vector.shape_cast %238 : vector<2xf32> to vector<2x1xf32>
    %240 = vector.broadcast %239 : vector<2x1xf32> to vector<2x4xf32>
    %241 = arith.subf %237, %240 : vector<2x4xf32>
    %242 = math.exp %241 : vector<2x4xf32>
    %cst_170 = arith.constant dense<0.000000e+00> : vector<2xf32>
    %243 = vector.multi_reduction <add>, %242, %cst_170 [1] : vector<2x4xf32> to vector<2xf32>
    %244 = vector.shape_cast %243 : vector<2xf32> to vector<2x1xf32>
    %245 = tpu.reciprocal %244 {approx = true} : vector<2x1xf32> -> vector<2x1xf32>
    %246 = vector.broadcast %245 : vector<2x1xf32> to vector<2x4xf32>
    %247 = arith.mulf %242, %246 : vector<2x4xf32>
    %c0_171 = arith.constant 0 : index
    %c0_172 = arith.constant 0 : index
    %248 = vector.load %arg7[%c0_171, %c0_172] : memref<2x4xf32, #tpu.memory_space<vmem>>, vector<2x4xf32>
    tpu.vector_store %arg7[%c0_171, %c0_172], %247 {strides = array<i32>} : memref<2x4xf32, #tpu.memory_space<vmem>>, vector<2x4xf32>,
    return
  }
  func.func @transform_0(%arg0: i32, %arg1: memref<32xi32, #tpu.memory_space<smem>>) -> (i32, i32) {
    %c0_i32 = arith.constant 0 : i32
    %c0_i32_0 = arith.constant 0 : i32
    %c0_i32_1 = arith.constant 0 : i32
    return %c0_i32, %c0_i32_0 : i32, i32
  }
  func.func @transform_1(%arg0: i32, %arg1: memref<32xi32, #tpu.memory_space<smem>>) -> (i32, i32) {
    %c0_i32 = arith.constant 0 : i32
    %c0_i32_0 = arith.constant 0 : i32
    %c0_i32_1 = arith.constant 0 : i32
    return %c0_i32, %c0_i32_0 : i32, i32
  }
  func.func @transform_2(%arg0: i32, %arg1: memref<32xi32, #tpu.memory_space<smem>>) -> (i32, i32) {
    %c0_i32 = arith.constant 0 : i32
    %c0_i32_0 = arith.constant 0 : i32
    %c0_i32_1 = arith.constant 0 : i32
    return %c0_i32, %c0_i32_0 : i32, i32
  }
  func.func @transform_3(%arg0: i32, %arg1: memref<32xi32, #tpu.memory_space<smem>>) -> (i32, i32) {
    %c0_i32 = arith.constant 0 : i32
    %c0_i32_0 = arith.constant 0 : i32
    %c0_i32_1 = arith.constant 0 : i32
    return %c0_i32, %c0_i32_0 : i32, i32
  }
  func.func @transform_4(%arg0: i32, %arg1: memref<32xi32, #tpu.memory_space<smem>>) -> (i32, i32) {
    %c0_i32 = arith.constant 0 : i32
    %c0_i32_0 = arith.constant 0 : i32
    %c0_i32_1 = arith.constant 0 : i32
    return %c0_i32, %c0_i32_0 : i32, i32
  }
  func.func @transform_5(%arg0: i32, %arg1: memref<32xi32, #tpu.memory_space<smem>>) -> (i32, i32) {
    %c0_i32 = arith.constant 0 : i32
    %c0_i32_0 = arith.constant 0 : i32
    %c0_i32_1 = arith.constant 0 : i32
    return %c0_i32, %c0_i32_0 : i32, i32
  }
  func.func @transform_6(%arg0: i32, %arg1: memref<32xi32, #tpu.memory_space<smem>>) -> (i32, i32) {
    %c0_i32 = arith.constant 0 : i32
    %c0_i32_0 = arith.constant 0 : i32
    %c0_i32_1 = arith.constant 0 : i32
    return %c0_i32, %c0_i32_0 : i32, i32
  }
}

</mosaic_0001>

<bundles_post_ra>
// kernel: cnn_forward.1
= control target key start
LH: loop header
LB: loop body
LE: loop exit
PB: predicated region body
PF: predicated region fallthrough
CT: control target
= control target key end

     0   :  { %s1311_s0 = inlined_call_operand.vmem [shape: s32[32], index: 0, kind: input, shape index: {}]   ;;  %s1312_s1 = inlined_call_operand.vmem [shape: f32[50,32], index: 1, kind: input, shape index: {}]   ;;  %s1313_s2 = inlined_call_operand.vmem [shape: bf16[160,48], index: 2, kind: input, shape index: {}]   ;;  %s1314_s3 = inlined_call_operand.vmem [shape: f32[32,48], index: 3, kind: input, shape index: {}]   ;;  %s1315_s4 = inlined_call_operand.vmem [shape: bf16[48,4], index: 4, kind: input, shape index: {}]   ;;  %s1316_s5 = inlined_call_operand.vmem [shape: f32[1,4], index: 5, kind: input, shape index: {}]   ;;  %s1317_s6 = inlined_call_operand.hbm [shape: f32[2,4], index: 6, kind: output, shape index: {0}]   ;;  %s1318_s7 = inlined_call_operand.hbm [shape: f32[2,48], index: 7, kind: output, shape index: {1}]  }
   0x1   :  { %s13_s26 = sshll.u32 %s1311_s0, 4  ;;  %s14_s26 = int_to_ptr.vmem [resolvable:$true] %s13_s26 }
   0x2   :  { %s928_s27 = scalar_lea.vmem %s14_s26, 16  ;;  %p933_p1 = scmp.lt.s32.totalorder %s14_s26, %s14_s26 }
   0x3   :  { %p929_p0 = scmp.ne.s32.totalorder %s14_s26, %s928_s27  ;;  %p934_p2 = scmp.lt.s32.totalorder %s928_s27, %s928_s27 }
   0x5   :  { %p935_p3 = por %p934_p2, %p933_p1 }
   0x7   :  { %p936_p4 = pnand %p935_p3, %p929_p0 }
   0x9   :  { %939 = shalt.err (!%p936_p4)  }
   0xa   :  { %s990_s28 = smov [#allocation4]  }
   0xb   :  { %16 = dma.vmem_to_smem %s14_s26, 16, %s990_s28, [#allocation3] }
   0xc   :  { %984 = dma.done.wait [#allocation3], 16 }
   0xd   :  { %985 = vsyncadd [#allocation3], 4294967280 }
   0xe   :  { %18 = sfence }
   0xf   :  { %19 = vsyncpa [#allocation6], 0  ;;  %v911_v0 = vld [vmem:[%s1313_s2 + $0x20] sm:$0xff]   ;;  %vm32_vm0 = vcmask 261120   ;;  %v912_v1 = vld [vmem:[%s1313_s2 + $0x10] sm:$0xff]   ;;  %v991_v3 = vmov 0.0  }
  0x10   :  { %856 = vmatprep.subr.bf16.mxu0 %v911_v0  ;;  %v913_v2 = vld [vmem:[%s1313_s2 + $0x28] sm:$0xff]   ;;  %33 = vst.msk [vmem:[#allocation2] sm:$0xff] %vm32_vm0, %v991_v3  ;;  %34 = vst.msk [vmem:[#allocation2 + $0x8] sm:$0xff] %vm32_vm0, %v991_v3  ;;  %vm35_vm1 = vcmask 257024   ;;  %840 = vmatprep.subr.bf16.mxu1 %v912_v1  ;;  %v914_v4 = vld [vmem:[%s1313_s2 + $0x18] sm:$0xff]   ;;  %vm43_vm2 = vcmask 253952  }
  0x11   :  { %37 = vst.msk [vmem:[#allocation2 + $0x18] sm:$0xff] %vm32_vm0, %v991_v3  ;;  %38 = vst.msk [vmem:[#allocation2 + $0x20] sm:$0xff] %vm32_vm0, %v991_v3  ;;  %857 = vmatpush3.bf16.msra.mxu0 %v911_v0  ;;  %841 = vmatpush3.bf16.msra.mxu1 %v912_v1  ;;  %s760_s13 = sld [smem:[#allocation4 + $0x1]]  ;;  %s761_s14 = sld [smem:[#allocation4 + $0x2]]  ;;  %v1063_v5 = vld [vmem:[%s1313_s2 + $0x30] sm:$0xff]   ;;  %v1068_v6 = vld [vmem:[%s1313_s2] sm:$0xff]  }
  0x12   :  { %36 = vst.msk [vmem:[#allocation2 + $0x10] sm:$0xf] %vm35_vm1, %v991_v3  ;;  %39 = vst.msk [vmem:[#allocation2 + $0x28] sm:$0xf] %vm35_vm1, %v991_v3  ;;  %858 = vmatprep.subr.bf16.mxu0 %v913_v2  ;;  %842 = vmatprep.subr.bf16.mxu1 %v914_v4  ;;  %s762_s15 = sld [smem:[#allocation4 + $0x3]]  ;;  %s763_s16 = sld [smem:[#allocation4 + $0x4]] }
  0x13   :  { %s764_s17 = sld [smem:[#allocation4 + $0x5]]  ;;  %s765_s18 = sld [smem:[#allocation4 + $0x6]] }
  0x14   :  { %s1070_s23 = sld [smem:[#allocation4 + $0x7]]  ;;  %s1072_s24 = sld [smem:[#allocation4 + $0x8]] }
  0x15   :  { %859 = vmatpush3.bf16.msra.mxu0 %v913_v2  ;;  %843 = vmatpush3.bf16.msra.mxu1 %v914_v4  ;;  %s1074_s25 = sld [smem:[#allocation4 + $0x9]]  ;;  %s1076_s26 = sld [smem:[#allocation4 + $0xa]] }
  0x16   :  { %864 = vmatprep.subr.bf16.mxu0 %v1063_v5  ;;  %s1079_s27 = sld [smem:[#allocation4 + $0xb]]  ;;  %s1081_s28 = sld [smem:[#allocation4 + $0xc]]  ;;  %848 = vmatprep.subr.bf16.mxu1 %v1068_v6 }
  0x17   :  { %s46_s0 = scalar_lea.vmem %s1312_s1, %s760_s13  ;;  %s50_s10 = scalar_lea.vmem %s1312_s1, %s761_s14 }
  0x18   :  { %v47_v7 = vld [vmem:[%s46_s0] sm:$0x1]  ;;  %s54_s19 = scalar_lea.vmem %s1312_s1, %s762_s15  ;;  %s58_s22 = scalar_lea.vmem %s1312_s1, %s763_s16 }
  0x19   :  { %v51_v8 = vld [vmem:[%s50_s10] sm:$0x1]  ;;  %48 = vst.msk [vmem:[#allocation2 + $0x1] sm:$0x1] %vm43_vm2, %v47_v7  ;;  %s62_s29 = scalar_lea.vmem %s1312_s1, %s764_s17  ;;  %s66_s15 = scalar_lea.vmem %s1312_s1, %s765_s18 }
  0x1a   :  { %52 = vst.msk [vmem:[#allocation2 + $0x2] sm:$0x1] %vm43_vm2, %v51_v8  ;;  %v55_v9 = vld [vmem:[%s54_s19] sm:$0x1]  ;;  %s70_s9 = scalar_lea.vmem %s1312_s1, %s1070_s23  ;;  %s74_s17 = scalar_lea.vmem %s1312_s1, %s1072_s24 }
  0x1b   :  { %v59_v10 = vld [vmem:[%s58_s22] sm:$0x1]  ;;  %56 = vst.msk [vmem:[#allocation2 + $0x3] sm:$0x1] %vm43_vm2, %v55_v9  ;;  %s78_s19 = scalar_lea.vmem %s1312_s1, %s1074_s25  ;;  %s82_s22 = scalar_lea.vmem %s1312_s1, %s1076_s26 }
  0x1c   :  { %60 = vst.msk [vmem:[#allocation2 + $0x4] sm:$0x1] %vm43_vm2, %v59_v10  ;;  %v63_v11 = vld [vmem:[%s62_s29] sm:$0x1]  ;;  %s86_s13 = scalar_lea.vmem %s1312_s1, %s1079_s27  ;;  %s90_s30 = scalar_lea.vmem %s1312_s1, %s1081_s28 }
  0x1d   :  { %v67_v12 = vld [vmem:[%s66_s15] sm:$0x1]  ;;  %64 = vst.msk [vmem:[#allocation2 + $0x5] sm:$0x1] %vm43_vm2, %v63_v11  ;;  %s772_s25 = sld [smem:[#allocation4 + $0xd]]  ;;  %s773_s26 = sld [smem:[#allocation4 + $0xe]] }
  0x1e   :  { %68 = vst.msk [vmem:[#allocation2 + $0x6] sm:$0x1] %vm43_vm2, %v67_v12  ;;  %v71_v13 = vld [vmem:[%s70_s9] sm:$0x1]  ;;  %s774_s0 = sld [smem:[#allocation4 + $0xf]]  ;;  %s776_s15 = sld [smem:[#allocation4 + $0x11]] }
  0x1f   :  { %v75_v14 = vld [vmem:[%s74_s17] sm:$0x1]  ;;  %72 = vst.msk [vmem:[#allocation2 + $0x7] sm:$0x1] %vm43_vm2, %v71_v13  ;;  %s777_s16 = sld [smem:[#allocation4 + $0x12]]  ;;  %s778_s27 = sld [smem:[#allocation4 + $0x13]] }
  0x20   :  { %76 = vst.msk [vmem:[#allocation2 + $0x8] sm:$0x1] %vm43_vm2, %v75_v14  ;;  %v79_v15 = vld [vmem:[%s78_s19] sm:$0x1]  ;;  %s779_s8 = sld [smem:[#allocation4 + $0x14]]  ;;  %s780_s9 = sld [smem:[#allocation4 + $0x15]] }
  0x21   :  { %v83_v16 = vld [vmem:[%s82_s22] sm:$0x1]  ;;  %80 = vst.msk [vmem:[#allocation2 + $0x9] sm:$0x1] %vm43_vm2, %v79_v15  ;;  %s781_s10 = sld [smem:[#allocation4 + $0x16]]  ;;  %s1138_s28 = sld [smem:[#allocation4 + $0x17]] }
  0x22   :  { %84 = vst.msk [vmem:[#allocation2 + $0xa] sm:$0x1] %vm43_vm2, %v83_v16  ;;  %v87_v17 = vld [vmem:[%s86_s13] sm:$0x1]  ;;  %s1140_s11 = sld [smem:[#allocation4 + $0x18]]  ;;  %s1145_s19 = sld [smem:[#allocation4 + $0x19]] }
  0x23   :  { %v91_v18 = vld [vmem:[%s90_s30] sm:$0x1]  ;;  %88 = vst.msk [vmem:[#allocation2 + $0xb] sm:$0x1] %vm43_vm2, %v87_v17  ;;  %s94_s12 = scalar_lea.vmem %s1312_s1, %s772_s25  ;;  %s98_s22 = scalar_lea.vmem %s1312_s1, %s773_s26 }
  0x24   :  { %92 = vst.msk [vmem:[#allocation2 + $0xc] sm:$0x1] %vm43_vm2, %v91_v18  ;;  %v95_v19 = vld [vmem:[%s94_s12] sm:$0x1]  ;;  %s102_s13 = scalar_lea.vmem %s1312_s1, %s774_s0  ;;  %s111_s30 = scalar_lea.vmem %s1312_s1, %s776_s15 }
  0x25   :  { %96 = vst.msk [vmem:[#allocation2 + $0xd] sm:$0x1] %vm43_vm2, %v95_v19  ;;  %v99_v20 = vld [vmem:[%s98_s22] sm:$0x1]  ;;  %s115_s18 = scalar_lea.vmem %s1312_s1, %s777_s16  ;;  %s119_s12 = scalar_lea.vmem %s1312_s1, %s778_s27 }
  0x26   :  { %v103_v21 = vld [vmem:[%s102_s13] sm:$0x1]  ;;  %100 = vst.msk [vmem:[#allocation2 + $0xe] sm:$0x1] %vm43_vm2, %v99_v20  ;;  %s123_s15 = scalar_lea.vmem %s1312_s1, %s779_s8  ;;  %s127_s23 = scalar_lea.vmem %s1312_s1, %s780_s9 }
  0x27   :  { %104 = vst.msk [vmem:[#allocation2 + $0xf] sm:$0x1] %vm43_vm2, %v103_v21  ;;  %v112_v22 = vld [vmem:[%s111_s30] sm:$0x1]  ;;  %s131_s14 = scalar_lea.vmem %s1312_s1, %s781_s10  ;;  %s135_s29 = scalar_lea.vmem %s1312_s1, %s1138_s28  ;;  %v180_v28 = vld [vmem:[#allocation2 + $0x1] sm:$0xff] }
  0x28   :  { %v116_v23 = vld [vmem:[%s115_s18] sm:$0x1]  ;;  %113 = vst.msk [vmem:[#allocation2 + $0x19] sm:$0x1] %vm43_vm2, %v112_v22  ;;  %s139_s17 = scalar_lea.vmem %s1312_s1, %s1140_s11  ;;  %v324_v29 = vld [vmem:[#allocation2 + $0x2] sm:$0xff]  ;;  %s143_s18 = scalar_lea.vmem %s1312_s1, %s1145_s19 }
  0x29   :  { %117 = vst.msk [vmem:[#allocation2 + $0x1a] sm:$0x1] %vm43_vm2, %v116_v23  ;;  %v120_v24 = vld [vmem:[%s119_s12] sm:$0x1]  ;;  %s785_s26 = sld [smem:[#allocation4 + $0x1a]]  ;;  %s786_s28 = sld [smem:[#allocation4 + $0x1b]] }
  0x2a   :  { %v124_v25 = vld [vmem:[%s123_s15] sm:$0x1]  ;;  %121 = vst.msk [vmem:[#allocation2 + $0x1b] sm:$0x1] %vm43_vm2, %v120_v24  ;;  %s787_s11 = sld [smem:[#allocation4 + $0x1c]]  ;;  %s788_s0 = sld [smem:[#allocation4 + $0x1d]] }
  0x2b   :  { %125 = vst.msk [vmem:[#allocation2 + $0x1c] sm:$0x1] %vm43_vm2, %v124_v25  ;;  %v128_v26 = vld [vmem:[%s127_s23] sm:$0x1]  ;;  %s789_s12 = sld [smem:[#allocation4 + $0x1e]] }
  0x2c   :  { %v132_v27 = vld [vmem:[%s131_s14] sm:$0x1]  ;;  %129 = vst.msk [vmem:[#allocation2 + $0x1d] sm:$0x1] %vm43_vm2, %v128_v26 }
  0x2d   :  { %133 = vst.msk [vmem:[#allocation2 + $0x1e] sm:$0x1] %vm43_vm2, %v132_v27  ;;  %v136_v30 = vld [vmem:[%s135_s29] sm:$0x1] }
  0x2e   :  { %v140_v31 = vld [vmem:[%s139_s17] sm:$0x1]  ;;  %137 = vst.msk [vmem:[#allocation2 + $0x1f] sm:$0x1] %vm43_vm2, %v136_v30 }
  0x2f   :  { %141 = vst.msk [vmem:[#allocation2 + $0x20] sm:$0x1] %vm43_vm2, %v140_v31  ;;  %v144_v32 = vld [vmem:[%s143_s18] sm:$0x1] }
  0x30   :  { %145 = vst.msk [vmem:[#allocation2 + $0x21] sm:$0x1] %vm43_vm2, %v144_v32 }
  0x31   :  { %20 = vsyncpa [#allocation8], 0  ;;  %s790_s20 = sld [smem:[#allocation4 + $0x1f]]  ;;  %s40_s21 = sld [smem:[#allocation4]]  ;;  %v181_v33 = vld [vmem:[#allocation2 + $0x9] sm:$0xff]  ;;  %v917_v55 = vld [vmem:[%s1313_s2 + $0x38] sm:$0xff]  }
  0x32   :  { %v325_v34 = vld [vmem:[#allocation2 + $0xa] sm:$0xff]  ;;  %s775_s15 = sld [smem:[#allocation4 + $0x10]]  ;;  %v184_v35 = vpack.c.bf16 %v181_v33, %v180_v28  ;;  %s147_s22 = scalar_lea.vmem %s1312_s1, %s785_s26  ;;  %v919_v59 = vld [vmem:[%s1313_s2 + $0x40] sm:$0xff]   ;;  %vm992_vm3 = vmmov 0   ;;  %vm579_vm4 = vcmask 392192   ;;  %vm600_vm5 = vcmask 1041409  }
  0x33   :  { %v328_v36 = vpack.c.bf16 %v325_v34, %v324_v29  ;;  %v148_v37 = vld [vmem:[%s147_s22] sm:$0x1]  ;;  %s151_s13 = scalar_lea.vmem %s1312_s1, %s786_s28  ;;  %s155_s8 = scalar_lea.vmem %s1312_s1, %s787_s11  ;;  %v171_v47 = vld [vmem:[#allocation2 + $0x8] sm:$0xff]  ;;  %v923_v12 = vld [vmem:[%s1315_s4 + $0x10] sm:$0xff]   ;;  %vm603_vm6 = vcmask 386048   ;;  %vm687_vm7 = vcmask 25600  }
  0x34   :  { %844 = vmatprep.mubr.msk.bf16.mxu1 %vm32_vm0, %v184_v35  ;;  %149 = vst.msk [vmem:[#allocation2 + $0x22] sm:$0x1] %vm43_vm2, %v148_v37  ;;  %v152_v38 = vld [vmem:[%s151_s13] sm:$0x1]  ;;  %s159_s25 = scalar_lea.vmem %s1312_s1, %s788_s0  ;;  %s163_s10 = scalar_lea.vmem %s1312_s1, %s789_s12  ;;  %v405_v48 = vld [vmem:[#allocation2 + $0x3] sm:$0xff]  ;;  %v406_v49 = vld [vmem:[#allocation2 + $0xb] sm:$0xff] }
  0x35   :  { %860 = vmatprep.mubr.msk.bf16.mxu0 %vm32_vm0, %v328_v36  ;;  %v156_v39 = vld [vmem:[%s155_s8] sm:$0x1]  ;;  %153 = vst.msk [vmem:[#allocation2 + $0x23] sm:$0x1] %vm43_vm2, %v152_v38  ;;  %v918_v56 = vld [vmem:[%s1313_s2 + $0x8] sm:$0xff]   ;;  %v409_v58 = vpack.c.bf16 %v406_v49, %v405_v48  ;;  %v569_v18 = vld [vmem:[%s1314_s3 + $0x10] sm:$0xff] }
  0x36   :  { %157 = vst.msk [vmem:[#allocation2 + $0x24] sm:$0x1] %vm43_vm2, %v156_v39  ;;  %v160_v40 = vld [vmem:[%s159_s25] sm:$0x1]  ;;  %v486_v0 = vld [vmem:[#allocation2 + $0x4] sm:$0xff]  ;;  %v487_v1 = vld [vmem:[#allocation2 + $0xc] sm:$0xff] }
  0x37   :  { %v164_v41 = vld [vmem:[%s163_s10] sm:$0x1]  ;;  %s167_s28 = scalar_lea.vmem %s1312_s1, %s790_s20  ;;  %s41_s16 = scalar_lea.vmem %s1312_s1, %s40_s21  ;;  %161 = vst.msk [vmem:[#allocation2 + $0x25] sm:$0x1] %vm43_vm2, %v160_v40  ;;  %v922_v11 = vld [vmem:[%s1315_s4 + $0x8] sm:$0xff]  }
  0x38   :  { %165 = vst.msk [vmem:[#allocation2 + $0x26] sm:$0x1] %vm43_vm2, %v164_v41  ;;  %v168_v42 = vld [vmem:[%s167_s28] sm:$0x1]  ;;  %s106_s22 = scalar_lea.vmem %s1312_s1, %s775_s15  ;;  %v568_v27 = vld [vmem:[%s1314_s3 + $0x8] sm:$0xff] }
  0x39   :  { %v42_v43 = vld [vmem:[%s41_s16] sm:$0x1]  ;;  %169 = vst.msk [vmem:[#allocation2 + $0x27] sm:$0x1] %vm43_vm2, %v168_v42  ;;  %s993_s16 = smov [#allocation7]  }
  0x3a   :  { %44 = vst.msk [vmem:[#allocation2] sm:$0x1] %vm43_vm2, %v42_v43  ;;  %v107_v44 = vld [vmem:[%s106_s22] sm:$0x1]  ;;  %s716_s0 = sshll.u32 %s993_s16, 4  ;;  %s717_s0 = int_to_ptr.vmem [resolvable:$true] %s716_s0 }
  0x3b   :  { %109 = vst.msk [vmem:[#allocation2 + $0x18] sm:$0x1] %vm43_vm2, %v107_v44  ;;  %v182_v45 = vld [vmem:[#allocation2 + $0x19] sm:$0xff]  ;;  %p945_p6 = scmp.lt.s32.totalorder %s717_s0, %s717_s0 }
  0x3c   :  { %v326_v46 = vld [vmem:[#allocation2 + $0x1a] sm:$0xff] }
  0x3d   :  { %v407_v60 = vld [vmem:[#allocation2 + $0x1b] sm:$0xff] }
  0x3e   :  { %v488_v7 = vld [vmem:[#allocation2 + $0x1c] sm:$0xff] }
  0x3f   :  { %v921_v10 = vld [vmem:[%s1315_s4] sm:$0xff]  }
  0x40   :  { %v183_v50 = vld [vmem:[#allocation2 + $0x21] sm:$0xff] }
  0x41   :  { %v327_v51 = vld [vmem:[#allocation2 + $0x22] sm:$0xff]  ;;  %v185_v53 = vpack.c.bf16 %v183_v50, %v182_v45 }
  0x42   :  { %v170_v52 = vld [vmem:[#allocation2] sm:$0xff]  ;;  %v329_v54 = vpack.c.bf16 %v327_v51, %v326_v46  ;;  %v172_v61 = vld [vmem:[#allocation2 + $0x18] sm:$0xff] }
  0x43   :  { %v174_v57 = vpack.c.bf16 %v171_v47, %v170_v52  ;;  %845 = vmatmul.mubr.msk.bf16.vlgmr.msra.gmra.mrb[0].mxu1 %vm32_vm0, %v185_v53  ;;  %v173_v62 = vld [vmem:[#allocation2 + $0x20] sm:$0xff] }
  0x44   :  { %861 = vmatmul.mubr.msk.bf16.vlgmr.msra.gmra.mrb[0].mxu0 %vm32_vm0, %v329_v54  ;;  %849 = vmatpush3.bf16.msra.mxu1 %v1068_v6  ;;  %v408_v63 = vld [vmem:[#allocation2 + $0x23] sm:$0xff]  ;;  %v175_v2 = vpack.c.bf16 %v173_v62, %v172_v61  ;;  %v811_v61 = vld [vmem:[%s1316_s5] ss:$0 sm:$0xff]  ;;  %s940_s5 = scalar_lea.vmem %s717_s0, 32 }
  0x45   :  { %865 = vmatpush3.bf16.msra.mxu0 %v1063_v5  ;;  %850 = vmatprep.subr.bf16.mxu1 %v918_v56  ;;  %v410_v4 = vpack.c.bf16 %v408_v63, %v407_v60  ;;  %v490_v5 = vpack.c.bf16 %v487_v1, %v486_v0  ;;  %v920_v6 = vld [vmem:[%s1313_s2 + $0x48] sm:$0xff]   ;;  %v567_v21 = vld [vmem:[%s1314_s3] sm:$0xff]  ;;  %p941_p5 = scmp.ne.s32.totalorder %s717_s0, %s940_s5  ;;  %p946_p7 = scmp.lt.s32.totalorder %s940_s5, %s940_s5 }
  0x46   :  { %866 = vmatprep.subr.bf16.mxu0 %v917_v55  ;;  %852 = vmatprep.mubr.msk.bf16.mxu1 %vm32_vm0, %v174_v57  ;;  %v489_v8 = vld [vmem:[#allocation2 + $0x24] sm:$0xff] }
  0x47   :  { %868 = vmatprep.mubr.msk.bf16.mxu0 %vm32_vm0, %v409_v58  ;;  %v491_v9 = vpack.c.bf16 %v489_v8, %v488_v7  ;;  %p947_p8 = por %p946_p7, %p945_p6 }
  0x48   :  { %851 = vmatpush3.bf16.msra.mxu1 %v918_v56 }
  0x49   :  { %867 = vmatpush3.bf16.msra.mxu0 %v917_v55  ;;  %880 = vmatprep.subr.bf16.mxu1 %v991_v3  ;;  %p948_p9 = pnand %p947_p8, %p941_p5 }
  0x4a   :  { %872 = vmatprep.subr.bf16.mxu0 %v919_v59 }
  0x4f   :  { %853 = vmatmul.mubr.msk.bf16.vlgmr.msra.gmra.mrb[0].mxu1 %vm32_vm0, %v175_v2 }
  0x50   :  { %869 = vmatmul.mubr.msk.bf16.vlgmr.msra.gmra.mrb[0].mxu0 %vm32_vm0, %v410_v4  ;;  %881 = vmatpush3.bf16.msra.mxu1 %v921_v10 }
  0x51   :  { %873 = vmatpush3.bf16.msra.mxu0 %v919_v59  ;;  %876 = vmatprep.mubr.msk.bf16.mxu0 %vm32_vm0, %v490_v5 }
  0x52   :  { %874 = vmatprep.subr.bf16.mxu0 %v920_v6  ;;  %882 = vmatprep.subr.bf16.mxu1 %v991_v3 }
  0x53   :  { %886 = vmatprep.mubr.msk.bf16.mxu1 %vm992_vm3, %v991_v3 }
  0x54   :  { %883 = vmatpush3.bf16.msra.mxu1 %v922_v11 }
  0x55   :  { %875 = vmatpush3.bf16.msra.mxu0 %v920_v6  ;;  %884 = vmatprep.subr.bf16.mxu1 %v991_v3  ;;  %v570_v3 = vld [vmem:[%s1314_s3 + $0x18] sm:$0xff] }
  0x58   :  { %885 = vmatpush3.bf16.msra.mxu1 %v923_v12 }
  0x5c   :  { %877 = vmatmul.mubr.msk.bf16.vlgmr.msra.gmra.mrb[0].mxu0 %vm32_vm0, %v491_v9 }
 0x122   :  { %v854_v13 = vpop.f32.mrb[0].mxu1 }
 0x123   :  { %v309_v14 = vpop.f32.mrb[1].mxu1 }
 0x124   :  { %v855_v15 = vpop.f32.mrb[2].mxu1 }
 0x125   :  { %v312_v16 = vpop.f32.mrb[3].mxu1 }
 0x12f   :  { %v878_v17 = vpop.f32.mrb[0].mxu0 }
 0x130   :  { %v890_v19 = vadd.f32 %v878_v17, %v854_v13  ;;  %v548_v20 = vpop.f32.mrb[1].mxu0 }
 0x131   :  { %v891_v22 = vadd.f32 %v548_v20, %v309_v14  ;;  %v879_v23 = vpop.f32.mrb[2].mxu0 }
 0x132   :  { %v573_v24 = vadd.f32 %v890_v19, %v569_v18  ;;  %v892_v25 = vadd.f32 %v879_v23, %v855_v15  ;;  %v551_v26 = vpop.f32.mrb[3].mxu0 }
 0x133   :  { %v571_v28 = vadd.f32 %v891_v22, %v567_v21  ;;  %v893_v29 = vadd.f32 %v551_v26, %v312_v16 }
 0x134   :  { %v577_v30 = vmax.f32 %v573_v24, 0.0  ;;  %v574_v31 = vadd.f32 %v892_v25, %v570_v3 }
 0x135   :  { %v575_v32 = vmax.f32 %v571_v28, 0.0  ;;  %v572_v33 = vadd.f32 %v893_v29, %v568_v27 }
 0x136   :  { %v578_v34 = vmax.f32 %v574_v31, 0.0  ;;  %v589_v36 = vsel %vm579_vm4, %v577_v30, -inf }
 0x137   :  { %v576_v35 = vmax.f32 %v572_v33, 0.0  ;;  %v580_v38 = vsel %vm579_vm4, %v575_v32, -inf }
 0x138   :  { %v590_v37 = vsel %vm579_vm4, %v578_v34, -inf }
 0x139   :  { %v591_v39 = vmax.f32 %v589_v36, %v590_v37  ;;  %v581_v40 = vsel %vm579_vm4, %v576_v35, -inf }
 0x13a   :  { %v582_v41 = vmax.f32 %v580_v38, %v581_v40 }
 0x13b   :  { %v592_v42 = vrot.slane %v591_v39, 4 }
 0x13c   :  { %v583_v43 = vrot.slane %v582_v41, 4 }
 0x13d   :  { %v593_v44 = vmax.f32 %v591_v39, %v592_v42 }
 0x13e   :  { %v584_v45 = vmax.f32 %v582_v41, %v583_v43 }
 0x13f   :  { %v594_v46 = vrot.slane %v593_v44, 2 }
 0x140   :  { %v585_v47 = vrot.slane %v584_v45, 2 }
 0x141   :  { %v595_v48 = vmax.f32 %v593_v44, %v594_v46 }
 0x142   :  { %v586_v49 = vmax.f32 %v584_v45, %v585_v47 }
 0x143   :  { %v596_v50 = vrot.slane %v595_v48, 1 }
 0x144   :  { %v587_v51 = vrot.slane %v586_v49, 1 }
 0x145   :  { %v597_v52 = vmax.f32 %v595_v48, %v596_v50 }
 0x146   :  { %v588_v53 = vmax.f32 %v586_v49, %v587_v51 }
 0x147   :  { %v606_v54 = vpack.c.bf16 %v597_v52, %v597_v52 }
 0x148   :  { %v605_v55 = vpack.c.bf16 %v588_v53, %v588_v53  ;;  %v601_v56 = vsel %vm600_vm5, %v597_v52, %v588_v53 }
 0x149   :  { %v623_v57 = vunpack.c.l.b16 %v606_v54  ;;  %604 = vst.msk [vmem:[#allocation7] sm:$0x3] %vm603_vm6, %v601_v56 }
 0x14a   :  { %v622_v58 = vunpack.c.l.b16 %v605_v55 }
 0x14c   :  { %v624_v59 = vsel %vm600_vm5, %v623_v57, %v622_v58 }
 0x14d   :  { %v625_v60 = vpack.c.b16 %v624_v59, %v624_v59 }
 0x14f   :  { %887 = vmatmul.mubr.msk.bf16.vlgmr.msra.gmra.mrb[4].mxu1 %vm579_vm4, %v625_v60 }
 0x222   :  { %v681_v62 = vpop.f32.mrb[4].mxu1 }
 0x223   :  { %v682_v63 = vadd.f32 %v811_v61, %v681_v62  ;;  %v888_v0 = vpop.f32.mrb[5].mxu1 }
 0x224   :  { %v684_v1 = vpop.f32.mrb[6].mxu1 }
 0x225   :  { %v889_v2 = vpop.f32.mrb[7].mxu1  ;;  %v688_v4 = vsel %vm687_vm7, %v682_v63, -inf }
 0x226   :  { %689 = vmax.xlane.f32.xlu0 %v688_v4 }
 0x2b3   :  { %v690_v5 = vpop.xlane.xlu0 %689 }
 0x2b4   :  { %v691_v6 = vsub.f32 %v682_v63, %v690_v5 }
 0x2b6   :  { %v692_v7 = vmul.f32 1.442695, %v691_v6 }
 0x2b8   :  { %924 = vpow2.f32 %v692_v7 }
 0x2c2   :  { %v925_v8 = vpop.eup %924 }
 0x2c3   :  { %v694_v9 = vsel %vm687_vm7, %v925_v8, 0.0 }
 0x2c4   :  { %695 = vadd.xlane.f32.xlu0 %v694_v9 }
 0x2c5   :  { %951 = shalt.err (!%p948_p9)
}
 0x2c6   :  { %s952_s20 = scalar_lea.hbm %s1318_s7, 32 }
 0x2c7   :  { %p953_p10 = scmp.ne.s32.totalorder %s1318_s7, %s952_s20  ;;  %p956_p11 = scmp.lt.u32.totalorder %s952_s20, %s1318_s7 }
 0x2c9   :  { %p958_p12 = pnand %p956_p11, %p953_p10 }
 0x2cb   :  { %961 = shalt.err (!%p958_p12)
}
 0x2cc   :  { %719 = dma.vmem_to_hbm [thread:$0]  %s717_s0, 32, %s1318_s7, [#allocation8]  }
 0x2cd   :  { %s994_s14 = smov [#allocation5]  }
 0x2ce   :  { %s706_s27 = sshll.u32 %s994_s14, 4  ;;  %s707_s27 = int_to_ptr.vmem [resolvable:$true] %s706_s27 }
 0x2cf   :  { %s962_s8 = scalar_lea.vmem %s707_s27, 32  ;;  %p967_p0 = scmp.lt.s32.totalorder %s707_s27, %s707_s27 }
 0x2d0   :  { %p963_p13 = scmp.ne.s32.totalorder %s707_s27, %s962_s8  ;;  %p968_p1 = scmp.lt.s32.totalorder %s962_s8, %s962_s8 }
 0x2d2   :  { %p969_p2 = por %p968_p1, %p967_p0 }
 0x2d4   :  { %p970_p3 = pnand %p969_p2, %p963_p13 }
 0x351   :  { %v696_v10 = vpop.xlane.xlu0 %695 }
 0x352   :  { %926 = vrcp.f32 %v696_v10 }
 0x35c   :  { %v927_v11 = vpop.eup %926 }
 0x35d   :  { %v698_v12 = vmul.f32 %v927_v11, %v925_v8 }
 0x35f   :  { %699 = vst.msk [vmem:[#allocation5] sm:$0x3] %vm687_vm7, %v698_v12 }
 0x360   :  { %973 = shalt.err (!%p970_p3)
}
 0x361   :  { %s974_s7 = scalar_lea.hbm %s1317_s6, 32 }
 0x362   :  { %p975_p4 = scmp.ne.s32.totalorder %s1317_s6, %s974_s7  ;;  %p978_p5 = scmp.lt.u32.totalorder %s974_s7, %s1317_s6 }
 0x364   :  { %p980_p6 = pnand %p978_p5, %p975_p4 }
 0x366   :  { %983 = shalt.err (!%p980_p6)
}
 0x367   :  { %709 = dma.vmem_to_hbm [thread:$0]  %s707_s27, 32, %s1317_s6, [#allocation6]  }
 0x368   :  { %986 = dma.done.wait [#allocation6], 32  }
 0x369   :  { %987 = vsyncadd [#allocation6], 4294967264 }
 0x36a   :  { %988 = dma.done.wait [#allocation8], 32  }
 0x36b   :  { %989 = vsyncadd [#allocation8], 4294967264 }
 0x36c   :  { %726 = vsyncpa [#allocation6], 1 }
 0x36d   :  { %727 = vsyncpa [#allocation8], 1 }

</bundles_post_ra>
